<compile_context>
chip_gen: v5e
topology: v5e:2x2
jax: 0.10.0
libtpu: 0.0.40
codegen_flags: <defaults>
</compile_context>

<pallas_src>
import functools

import jax
import jax.numpy as jnp
from jax.experimental import pallas as pl
from jax.experimental.pallas import tpu as pltpu


# --------------------------------------------------------------------------- #
# Kernel A: tiled global max-pool over the flattened spatial axis.
# --------------------------------------------------------------------------- #
def _maxpool_kernel(hw_total, needs_mask, x_ref, o_ref, acc_ref):
    # x_ref  : (C, hw_tile)   one spatial tile of one batch element
    # o_ref  : (C, 1)         pooled max for this batch element
    # acc_ref: (C, 1) f32     running-max accumulator (persists across k)
    k = pl.program_id(1)

    @pl.when(k == 0)
    def _init():
        acc_ref[...] = jnp.full_like(acc_ref, -jnp.inf)

    tile = x_ref[...].astype(jnp.float32)                   # (C, hw_tile)
    if needs_mask:  # static: only emitted when HW % hw_tile != 0
        hw_tile = tile.shape[-1]
        col = jax.lax.broadcasted_iota(jnp.int32, tile.shape, 1) + k * hw_tile
        tile = jnp.where(col < hw_total, tile, -jnp.inf)

    acc_ref[...] = jnp.maximum(acc_ref[...],
                               jnp.max(tile, axis=-1, keepdims=True))

    @pl.when(k == pl.num_programs(1) - 1)
    def _finalize():
        o_ref[...] = acc_ref[...].astype(o_ref.dtype)


# --------------------------------------------------------------------------- #
# Kernel B: batched FC1 -> ReLU -> FC2 -> sigmoid on the pooled (N, C) matrix.
# Weights are pre-transposed in the wrapper so no in-kernel transpose is needed.
# --------------------------------------------------------------------------- #
def _fc_kernel(pooled_ref, w1t_ref, w2t_ref, o_ref):
    h = jnp.dot(pooled_ref[...], w1t_ref[...],
                preferred_element_type=jnp.float32)          # (N, C//r)
    h = jnp.maximum(h, 0.0)                                  # ReLU
    out = jnp.dot(h, w2t_ref[...],
                  preferred_element_type=jnp.float32)        # (N, C)
    o_ref[...] = jax.nn.sigmoid(out).astype(o_ref.dtype)


def _choose_hw_tile(hw, c, itemsize, target_bytes=8 * 1024 * 1024):
    """Largest spatial tile (multiple of 128 lanes) with <= ~8 MiB per buffer."""
    if hw * c * itemsize <= target_bytes:
        return hw                                            # full extent is allowed
    max_lanes = max(128, (target_bytes // (c * itemsize)) // 128 * 128)
    return min(hw, max_lanes)


def channel_attention(x, w1, w2, *, hw_tile=None,
                      vmem_limit_bytes=32 * 1024 * 1024):
    """x: (N, C, H, W); w1: (C//r, C); w2: (C, C//r)  ->  (N, C, 1, 1)."""
    N, C, H, W = x.shape
    hidden = w1.shape[0]
    HW = H * W
    x_flat = x.reshape(N, C, HW)

    if hw_tile is None:
        hw_tile = _choose_hw_tile(HW, C, jnp.dtype(x.dtype).itemsize)
    num_k = pl.cdiv(HW, hw_tile)
    needs_mask = (HW % hw_tile) != 0

    pooled = pl.pallas_call(
        functools.partial(_maxpool_kernel, HW, needs_mask),
        out_shape=jax.ShapeDtypeStruct((N, C, 1), jnp.float32),
        grid_spec=pltpu.PrefetchScalarGridSpec(
            num_scalar_prefetch=0,
            grid=(N, num_k),
            in_specs=[
                # Squeeze the batch dim: kernel sees a clean (C, hw_tile) tile.
                pl.BlockSpec((None, C, hw_tile), lambda n, k: (n, 0, k)),
            ],
            out_specs=pl.BlockSpec((None, C, 1), lambda n, k: (n, 0, 0)),
            scratch_shapes=[pltpu.VMEM((C, 1), jnp.float32)],
        ),
        compiler_params=pltpu.CompilerParams(
            # Batch is parallel (megacore-shardable); spatial reduction is last
            # and "arbitrary" (accumulator residency).
            dimension_semantics=("parallel", "arbitrary"),
            vmem_limit_bytes=vmem_limit_bytes,
        ),
    )(x_flat)

    # Tiny batched FC: one (N, C) x (C, C//r) matmul instead of N matmuls at M=1.
    pooled2d = pooled.reshape(N, C)
    w1t = jnp.transpose(w1)   # (C, hidden)  -- transposed once, outside the kernel
    w2t = jnp.transpose(w2)   # (hidden, C)

    out = pl.pallas_call(
        _fc_kernel,
        out_shape=jax.ShapeDtypeStruct((N, C), jnp.float32),
    )(pooled2d, w1t, w2t)

    return out.reshape(N, C, 1, 1)


def channel_attention_ref(x, w1, w2):
    pooled = jnp.max(x, axis=(2, 3))                # (N, C)
    h = jnp.maximum(pooled @ w1.T, 0.0)             # (N, C//r)
    out = jax.nn.sigmoid(h @ w2.T)                  # (N, C)
    return out.reshape(*out.shape, 1, 1)


if __name__ == "__main__":
    N, C, H, W = 2, 8, 16, 16
    ratio = 4
    hidden = C // ratio

    key = jax.random.PRNGKey(0)
    kx, k1, k2 = jax.random.split(key, 3)
    x = jax.random.normal(kx, (N, C, H, W), dtype=jnp.float32)
    # Deterministic synthetic weights (conv 1x1 weights squeezed to 2D).
    w1 = jax.random.normal(k1, (hidden, C), dtype=jnp.float32) * 0.5
    w2 = jax.random.normal(k2, (C, hidden), dtype=jnp.float32) * 0.5

    out = channel_attention(x, w1, w2)
    out = jax.block_until_ready(out)

    ref = channel_attention_ref(x, w1, w2)
    assert out.shape == (N, C, 1, 1)
    assert jnp.allclose(out, ref, atol=1e-5, rtol=1e-5), "mismatch vs reference"

    # Also exercise the spatial-tiling / masking path (partial last tile).
    out_tiled = channel_attention(x, w1, w2, hw_tile=128)  # HW=256 -> 2 tiles
    out_tiled = jax.block_until_ready(out_tiled)
    assert jnp.allclose(out_tiled, ref, atol=1e-5, rtol=1e-5), "tiled mismatch"

    print("KERNEL_OK")
</pallas_src>

<mosaic_0001>
module attributes {stable_mosaic.version = 11 : i64} {
  func.func @_maxpool_kernel(%arg0: i32, %arg1: i32, %arg2: memref<1x8x256xf32, #tpu.memory_space<vmem>>, %arg3: memref<1x8x1xf32, #tpu.memory_space<vmem>>, %arg4: memref<8x1xf32, #tpu.memory_space<vmem>>) attributes {dimension_semantics = [#tpu.dimension_semantics<parallel>, #tpu.dimension_semantics<arbitrary>], iteration_bounds = array<i64: 2, 1>, scalar_prefetch = 0 : i64, scratch_operands = 1 : i64, tpu.core_type = #tpu.core_type<tc>, window_params = [{transform_indices = @transform_0, window_bounds = array<i64: 1, 8, 256>}, {transform_indices = @transform_1, window_bounds = array<i64: 1, 8, 1>}]} {
    %c0_i32 = arith.constant 0 : i32
    %0 = arith.cmpi eq, %arg1, %c0_i32 : i32
    %1 = arith.extui %0 : i1 to i32
    %c0_i32_0 = arith.constant 0 : i32
    %2 = arith.cmpi ne, %1, %c0_i32_0 : i32
    scf.if %2 {
      %cst_9 = arith.constant 0xFF800000 : f32
      %13 = vector.broadcast %cst_9 : f32 to vector<8x1xf32>
      %c0_10 = arith.constant 0 : index
      %c0_11 = arith.constant 0 : index
      %14 = vector.load %arg4[%c0_10, %c0_11] : memref<8x1xf32, #tpu.memory_space<vmem>>, vector<8x1xf32>
      tpu.vector_store %arg4[%c0_10, %c0_11], %13 {strides = array<i32>} : memref<8x1xf32, #tpu.memory_space<vmem>>, vector<8x1xf32>,
    } else {
    }
    %c0 = arith.constant 0 : index
    %c0_1 = arith.constant 0 : index
    %c0_2 = arith.constant 0 : index
    %3 = vector.load %arg2[%c0, %c0_1, %c0_2] : memref<1x8x256xf32, #tpu.memory_space<vmem>>, vector<1x8x256xf32>
    %4 = vector.shape_cast %3 : vector<1x8x256xf32> to vector<8x256xf32>
    %c0_3 = arith.constant 0 : index
    %c0_4 = arith.constant 0 : index
    %5 = vector.load %arg4[%c0_3, %c0_4] : memref<8x1xf32, #tpu.memory_space<vmem>>, vector<8x1xf32>
    %cst = arith.constant dense<0xFF800000> : vector<8xf32>
    %6 = vector.multi_reduction <maximumf>, %4, %cst [1] : vector<8x256xf32> to vector<8xf32>
    %7 = vector.shape_cast %6 : vector<8xf32> to vector<8x1xf32>
    %8 = arith.maximumf %5, %7 : vector<8x1xf32>
    %c0_5 = arith.constant 0 : index
    %c0_6 = arith.constant 0 : index
    %9 = vector.load %arg4[%c0_5, %c0_6] : memref<8x1xf32, #tpu.memory_space<vmem>>, vector<8x1xf32>
    tpu.vector_store %arg4[%c0_5, %c0_6], %8 {strides = array<i32>} : memref<8x1xf32, #tpu.memory_space<vmem>>, vector<8x1xf32>,
    %c0_i32_7 = arith.constant 0 : i32
    %10 = arith.cmpi eq, %arg1, %c0_i32_7 : i32
    %11 = arith.extui %10 : i1 to i32
    %c0_i32_8 = arith.constant 0 : i32
    %12 = arith.cmpi ne, %11, %c0_i32_8 : i32
    scf.if %12 {
      %c0_9 = arith.constant 0 : index
      %c0_10 = arith.constant 0 : index
      %13 = vector.load %arg4[%c0_9, %c0_10] : memref<8x1xf32, #tpu.memory_space<vmem>>, vector<8x1xf32>
      %c0_11 = arith.constant 0 : index
      %c0_12 = arith.constant 0 : index
      %c0_13 = arith.constant 0 : index
      %14 = vector.load %arg3[%c0_11, %c0_12, %c0_13] : memref<1x8x1xf32, #tpu.memory_space<vmem>>, vector<1x8x1xf32>
      %15 = vector.shape_cast %14 : vector<1x8x1xf32> to vector<8x1xf32>
      %16 = vector.shape_cast %13 : vector<8x1xf32> to vector<1x8x1xf32>
      tpu.vector_store %arg3[%c0_11, %c0_12, %c0_13], %16 {strides = array<i32>} : memref<1x8x1xf32, #tpu.memory_space<vmem>>, vector<1x8x1xf32>,
    } else {
    }
    return
  }
  func.func @transform_0(%arg0: i32, %arg1: i32) -> (i32, i32, i32) {
    %c0_i32 = arith.constant 0 : i32
    %c0_i32_0 = arith.constant 0 : i32
    return %arg0, %c0_i32, %arg1 : i32, i32, i32
  }
  func.func @transform_1(%arg0: i32, %arg1: i32) -> (i32, i32, i32) {
    %c0_i32 = arith.constant 0 : i32
    %c0_i32_0 = arith.constant 0 : i32
    %c0_i32_1 = arith.constant 0 : i32
    return %arg0, %c0_i32, %c0_i32_0 : i32, i32, i32
  }
}

</mosaic_0001>

<bundles_post_ra>
// kernel: tpu_custom_call.1
= control target key start
LH: loop header
LB: loop body
LE: loop exit
PB: predicated region body
PF: predicated region fallthrough
CT: control target
= control target key end

     0   :  { %6 = vsyncpa [#allocation4], 0  ;;  %s501_s0 = inlined_call_operand.hbm [shape: f32[2,8,256], index: 0, kind: input, shape index: {}]   ;;  %s502_s1 = inlined_call_operand.vmem [shape: f32[2,8,1], index: 1, kind: output, shape index: {}]  }
   0x1   :  { %8 = vsyncpa [#allocation4 + $0x1], 0  ;;  %s410_s6 = smov 0   ;;  %s412_s7 = smov 0  }
   0x2   :  { %s414_s8 = smov 0   ;;  %s416_s9 = smov 0  }
   0x3   :  { %s418_s10 = smov 0   ;;  %s420_s11 = smov 0  }
   0x4 LB: > { %s248_s12 = sadd.s32 4294967295, %s397_s11   ;;  %s26_s13 = sadd.s32 1, %s393_s10  ;;  %s397_s11 = sphi %s420_s11, %s14_s11   ;;  %s393_s10 = sphi %s418_s10, %s509_s10   ;;  %s389_s9 = sphi %s416_s9, %s508_s9   ;;  %s385_s8 = sphi %s414_s8, %s507_s8   ;;  %s381_s7 = sphi %s412_s7, %s506_s7   ;;  %s377_s6 = sphi %s410_s6, %s505_s6  }
   0x5   : > { %p28_p0 = scmp.ge.s32.totalorder %s26_s13, 2  ;;  %s35_s14 = sadd.s32 1, %s385_s8 }
   0x6   : > { %p42_p1 = scmp.ne.s32.totalorder %s385_s8, %s381_s7  ;;  %p43_p2 = scmp.eq.s32.totalorder %s397_s11, 0 }
   0x7   : > { %s511_s13 = smov (%p28_p0, %s26_s13), 0  ;;  %p48_p4 = scmp.ne.s32.totalorder %s381_s7, %s377_s6 }
   0x8   : > { %p446_p3 = por %p43_p2, %p42_p1  ;;  %s30_s16 = ssub.s32 %s393_s10, %s511_s13 }
   0x9   : > { %p49_p5 = scmp.eq.s32.totalorder %s248_s12, 0  ;;  %p33_p6 = scmp.eq.s32.totalorder %s30_s16, 0 }
   0xa   : > { %p267_p8 = scmp.lt.s32.totalorder %s397_s11, 2  ;;  %s98_s19 = sand.u32 1, %s385_s8  }
   0xb   : > { %p453_p7 = por %p49_p5, %p48_p4  ;;  %s260_s20 = sshll.u32 %s393_s10, 4 }
   0xc   : > { %s459_s18 = scalar_select %p33_p6, %s385_s8, %s35_s14  }
   0xd   : > { %s252_s21 = sshll.u32 %s98_s19, 4  ;;  %s109_s24 = scalar_lea.hbm %s501_s0, %s260_s20 }
   0xe   : > { %s111_s25 = sshll.u32 %s109_s24, 4  ;;  %s102_s26 = scalar_lea.vmem [#allocation3], %s252_s21  ;;  %s112_s25 = int_to_ptr.hbm [resolvable:$true] %s111_s25 }
   0xf   : > { %s113_s27 = sshll.u32 %s102_s26, 4  ;;  %p264_p9 = pnand %p267_p8, %p446_p3  ;;  %s114_s27 = int_to_ptr.vmem [resolvable:$true] %s113_s27 }
  0x10   : > { %p255_p10 = scmp.ge.s32.totalorder %s397_s11, 1  ;;  %p118_p11 = scmp.lt.s32.totalorder %s397_s11, 3 }
  0x11   : > { %s99_s28 = scalar_lea.sflag [#allocation4], %s98_s19 }
  0x12   : > { %266 = dma.hbm_to_vmem [thread:$0]  (!%p264_p9), %s112_s25, 256, %s114_s27, %s99_s28  }
  0x13   : > { %p119_p12 = pnand %p255_p10, %p118_p11 }
  0x14   : > { %s124_s29 = sand.u32 (!%p119_p12), 1, %s381_s7  }
  0x15   : > { %122 = sbr.rel (%p119_p12) target bundleno = 157 (0x9d), region = 24  ;;  %s256_s30 = sshll.u32 (!%p119_p12), %s124_s29, 4 }
  0x16   : > { %s125_s2 = scalar_lea.sflag (!%p119_p12), [#allocation4], %s124_s29  ;;  %s128_s3 = scalar_lea.vmem (!%p119_p12), [#allocation3], %s256_s30 }
  0x1a   : > { %372 = dma.done.wait (%p453_p7), %s125_s2, 256  }
  0x1b   : > { %374 = vsyncadd (%p453_p7), %s125_s2, 4294967040  ;;  %vm156_vm0 = vcmask 7168   ;;  %v399_v0 = vmov -inf   ;;  %v158_v1 = vld [vmem:[%s128_s3] sm:$0xff]  ;;  %v159_v2 = vld [vmem:[%s128_s3 + $0x8] sm:$0xff]  ;;  %p148_p13 = scmp.lt.s32.totalorder %s389_s9, 1 }
  0x1c   : > { %157 = vst.msk [vmem:[#allocation2] sm:$0xff] %vm156_vm0, %v399_v0  ;;  %v161_v3 = vmax.f32 %v158_v1, %v159_v2 }
  0x1d   : > { %s513_s9 = smov (!%p148_p13, %s389_s9), 1 }
  0x1e   : > { %162 = vmax.xlane.f32.xlu0 %v161_v3  ;;  %s257_s4 = sshll.u32 %s513_s9, 3 }
  0x1f   : > { %s151_s12 = scalar_lea.vmem %s502_s1, %s257_s4 }
  0x23   : > { %v160_v4 = vld [vmem:[#allocation2] sm:$0xff] }
  0x91   : > { %v163_v5 = vpop.xlane.xlu0 %162 }
  0x92   : > { %v164_v6 = vmax.f32 %v160_v4, %v163_v5 }
  0x94   : > { %166 = vst.msk [vmem:[#allocation2] sm:$0xff] %vm156_vm0, %v164_v6 }
  0x9b   : > { %v170_v7 = vld [vmem:[#allocation2] sm:$0xff] }
  0x9c   : > { %171 = vst.msk [vmem:[%s151_s12] sm:$0xff] %vm156_vm0, %v170_v7 }
  0x9d PF: > { %s14_s11 = sadd.s32 1, %s397_s11   ;;  %s505_s6 = smov %s381_s7 }
  0x9e   : > { %p11_p0 = scmp.ge.s32.totalorder %s14_s11, 4   ;;  %s506_s7 = smov %s385_s8 }
  0x9f   : > { %s507_s8 = smov %s459_s18  ;;  %s508_s9 = smov %s393_s10 }
  0xa0   : > { %s509_s10 = smov %s511_s13  ;;  %13 = sbr.rel (!%p11_p0) target bundleno = 4 (0x4), region = 72 }
  0xa5   :  { %191 = vsyncpa [#allocation4], 1 }
  0xa6   :  { %193 = vsyncpa [#allocation4 + $0x1], 1 }

</bundles_post_ra>
